<compile_context>
chip_gen: v5e
topology: v5e:2x2
jax: 0.10.0
libtpu: 0.0.40
codegen_flags: <defaults>
</compile_context>

<pallas_src>
import functools

import jax
import jax.numpy as jnp
from jax.experimental import pallas as pl
from jax.experimental.pallas import tpu as pltpu


def ffm_kernel(xsp_ref, xcp_ref, w0sp_ref, w0cp_ref, bias_ref, w1_ref, w2_ref,
               out_ref, acc_ref, att_ref, *, inv_hw):
    """Grid = (N, pass, hw_tile); channel-major tiles.

    xsp_ref  : (1, C1, tHW)   fsp tile (f32 in HBM, cast to bf16 for the MXU)
    xcp_ref  : (1, C2, tHW)   fcp tile
    w0sp_ref : (Cout, C1)     bf16, BN scale folded in
    w0cp_ref : (Cout, C2)     bf16, BN scale folded in
    bias_ref : (Cout, 1)      folded BN bias (f32)
    w1_ref   : (Cmid, Cout)   squeeze 1x1 conv (f32)
    w2_ref   : (Cout, Cmid)   excite 1x1 conv (f32)
    out_ref  : (1, Cout, tHW)
    acc_ref  : (Cout, 1)      VMEM scratch — GAP channel-sum accumulator
    att_ref  : (Cout, 1)      VMEM scratch — (1 + attention)
    """
    p = pl.program_id(1)
    hw = pl.program_id(2)
    n_hw = pl.num_programs(2)

    # 1x1 conv (BN scale folded into the weights) + bias + ReLU, recomputed in
    # both passes.  bf16 operands, f32 accumulation.
    xsp = xsp_ref[0].astype(jnp.bfloat16)                        # (C1, tHW)
    xcp = xcp_ref[0].astype(jnp.bfloat16)                        # (C2, tHW)
    feat = jnp.dot(w0sp_ref[...], xsp, preferred_element_type=jnp.float32)
    feat = feat + jnp.dot(w0cp_ref[...], xcp, preferred_element_type=jnp.float32)
    feat = jnp.maximum(feat + bias_ref[...], 0.0)                # (Cout, tHW)

    @pl.when(p == 0)
    def _accumulate_pass():
        @pl.when(hw == 0)
        def _():
            acc_ref[...] = jnp.zeros_like(acc_ref)
        acc_ref[...] += jnp.sum(feat, axis=1, keepdims=True)     # (Cout, 1)

        # Last tile of pass 0: finish the global average pool and compute the
        # squeeze-excite attention once per batch element.
        @pl.when(hw == n_hw - 1)
        def _():
            pooled = acc_ref[...] * inv_hw                       # (Cout, 1)
            a = jnp.dot(w1_ref[...], pooled,
                        preferred_element_type=jnp.float32)      # (Cmid, 1)
            a = jnp.maximum(a, 0.0)
            a = jnp.dot(w2_ref[...], a,
                        preferred_element_type=jnp.float32)      # (Cout, 1)
            a = 1.0 / (1.0 + jnp.exp(-a))                        # sigmoid
            att_ref[...] = a + 1.0                               # feat*a + feat == feat*(1+a)

    @pl.when(p == 1)
    def _apply_pass():
        out_ref[0] = (feat * att_ref[...]).astype(out_ref.dtype)


def _pick_block_hw(hw, target=512):
    """Largest multiple of 128 that divides HW and is <= target (lane-dense)."""
    if hw % 128 != 0:
        return hw  # fall back to a single full-width block (always legal)
    t = min(target, hw)
    t -= t % 128
    while hw % t != 0:
        t -= 128
    return t


def feature_fusion_module(fsp, fcp, params, *, block_hw=None):
    """fsp, fcp: NCHW float32. Returns NCHW float32 of shape (N, out_chan, H, W)."""
    w0 = params["w0"]            # (Cin, Cout)
    bn_scale = params["bn_scale"]
    bn_bias = params["bn_bias"]
    w1 = params["w1"]            # (Cout, Cmid)
    w2 = params["w2"]            # (Cmid, Cout)

    N, C1, H, W = fsp.shape
    C2 = fcp.shape[1]
    Cin = C1 + C2
    Cout = w0.shape[1]
    Cmid = w1.shape[1]
    HW = H * W

    # Channel-major: NCHW -> (N, C, HW).  Pure reshapes — no transpose, no concat.
    xsp = fsp.reshape(N, C1, HW)
    xcp = fcp.reshape(N, C2, HW)

    # Fold BN scale into the conv weight, transpose to (Cout, Cin), split per
    # input (no concat), cast to bf16 for the MXU.
    scale = bn_scale.reshape(Cout)
    w0_f = (w0 * scale[None, :]).T                   # (Cout, Cin), f32
    w0_sp = w0_f[:, :C1].astype(jnp.bfloat16)        # (Cout, C1)
    w0_cp = w0_f[:, C1:].astype(jnp.bfloat16)        # (Cout, C2)
    bias = bn_bias.reshape(Cout, 1).astype(jnp.float32)
    w1_t = jnp.transpose(w1).astype(jnp.float32)     # (Cmid, Cout)
    w2_t = jnp.transpose(w2).astype(jnp.float32)     # (Cout, Cmid)

    if block_hw is None:
        block_hw = _pick_block_hw(HW)
    assert HW % block_hw == 0, (HW, block_hw)
    n_hw = HW // block_hw

    kernel = functools.partial(ffm_kernel, inv_hw=1.0 / HW)

    grid_spec = pltpu.PrefetchScalarGridSpec(
        num_scalar_prefetch=0,
        grid=(N, 2, n_hw),
        in_specs=[
            pl.BlockSpec((1, C1, block_hw), lambda n, p, hw: (n, 0, hw)),
            pl.BlockSpec((1, C2, block_hw), lambda n, p, hw: (n, 0, hw)),
            pl.BlockSpec((Cout, C1), lambda n, p, hw: (0, 0)),
            pl.BlockSpec((Cout, C2), lambda n, p, hw: (0, 0)),
            pl.BlockSpec((Cout, 1), lambda n, p, hw: (0, 0)),
            pl.BlockSpec((Cmid, Cout), lambda n, p, hw: (0, 0)),
            pl.BlockSpec((Cout, Cmid), lambda n, p, hw: (0, 0)),
        ],
        # p*hw keeps the output block pinned at (n, 0, 0) during the accumulate
        # pass (no writeback); every block is written exactly once in pass 1.
        out_specs=pl.BlockSpec((1, Cout, block_hw), lambda n, p, hw: (n, 0, p * hw)),
        scratch_shapes=[
            pltpu.VMEM((Cout, 1), jnp.float32),   # GAP channel-sum accumulator
            pltpu.VMEM((Cout, 1), jnp.float32),   # (1 + attention)
        ],
    )

    in_bytes = N * Cin * HW * 4
    out_bytes = N * Cout * HW * 4
    cost = pl.CostEstimate(
        flops=2 * 2 * N * HW * Cin * Cout,        # main matmul, both passes
        transcendentals=N * Cout,                 # sigmoid exp
        bytes_accessed=2 * in_bytes + out_bytes,  # inputs read twice (recompute)
    )

    out_flat = pl.pallas_call(
        kernel,
        out_shape=jax.ShapeDtypeStruct((N, Cout, HW), jnp.float32),
        grid_spec=grid_spec,
        compiler_params=pltpu.CompilerParams(
            dimension_semantics=("parallel", "arbitrary", "arbitrary"),
            vmem_limit_bytes=48 * 1024 * 1024,    # fits v7x's 64 MiB with headroom
        ),
        cost_estimate=cost,
    )(xsp, xcp, w0_sp, w0_cp, bias, w1_t, w2_t)

    return out_flat.reshape(N, Cout, H, W)


def init_params(key, in_chan, out_chan):
    """Deterministic synthetic init mirroring the module's __init__ shapes.

    kaiming_normal_(a=1) => std = 1/sqrt(fan_in) for 1x1 convs.
    """
    mid = out_chan // 4
    k0, k1, k2 = jax.random.split(key, 3)
    w0 = jax.random.normal(k0, (in_chan, out_chan), jnp.float32) / jnp.sqrt(in_chan)
    w1 = jax.random.normal(k1, (out_chan, mid), jnp.float32) / jnp.sqrt(out_chan)
    w2 = jax.random.normal(k2, (mid, out_chan), jnp.float32) / jnp.sqrt(mid)
    # Freshly-initialized BatchNorm2d in eval mode: gamma=1, beta=0, mean=0, var=1
    eps = 1e-5
    gamma = jnp.ones((out_chan,), jnp.float32)
    beta = jnp.zeros((out_chan,), jnp.float32)
    running_mean = jnp.zeros((out_chan,), jnp.float32)
    running_var = jnp.ones((out_chan,), jnp.float32)
    bn_scale = gamma / jnp.sqrt(running_var + eps)
    bn_bias = beta - running_mean * bn_scale
    return {
        "w0": w0,
        "bn_scale": bn_scale.reshape(1, out_chan),
        "bn_bias": bn_bias.reshape(1, out_chan),
        "w1": w1,
        "w2": w2,
    }


def reference_forward(fsp, fcp, params):
    """Pure-JAX f32 reference of the same math (NCHW in/out)."""
    fcat = jnp.concatenate([fsp, fcp], axis=1)                   # (N, Cin, H, W)
    x = jnp.transpose(fcat, (0, 2, 3, 1))                        # NHWC
    feat = jnp.einsum("nhwc,co->nhwo", x, params["w0"])
    feat = feat * params["bn_scale"][0] + params["bn_bias"][0]
    feat = jnp.maximum(feat, 0.0)
    pooled = jnp.mean(feat, axis=(1, 2))                         # (N, Cout)
    a = jnp.maximum(pooled @ params["w1"], 0.0)
    a = jax.nn.sigmoid(a @ params["w2"])                         # (N, Cout)
    out = feat * a[:, None, None, :] + feat
    return jnp.transpose(out, (0, 3, 1, 2))                      # NCHW


if __name__ == "__main__":
    key = jax.random.PRNGKey(0)
    k_fsp, k_fcp, k_par = jax.random.split(key, 3)

    # Small shapes: batch=2, fsp/fcp channels=2 each (in_chan=4), out_chan=8, 16x16
    N, C_sp, C_cp, H, W = 2, 2, 2, 16, 16
    in_chan = C_sp + C_cp
    out_chan = 8

    fsp = jax.random.normal(k_fsp, (N, C_sp, H, W), jnp.float32)
    fcp = jax.random.normal(k_fcp, (N, C_cp, H, W), jnp.float32)
    params = init_params(k_par, in_chan, out_chan)

    # block_hw=128 -> 2 spatial tiles per image, exercising the two-pass
    # accumulate-then-apply path.
    out = feature_fusion_module(fsp, fcp, params, block_hw=128)
    out = jax.block_until_ready(out)

    ref = reference_forward(fsp, fcp, params)
    assert out.shape == (N, out_chan, H, W), out.shape
    # bf16 MXU operands -> loosened tolerance vs the f32 reference.
    assert jnp.allclose(out, ref, atol=2e-2, rtol=2e-2), "mismatch vs JAX reference"

    print("KERNEL_OK")
</pallas_src>

<mosaic_0001>
module attributes {stable_mosaic.version = 11 : i64} {
  func.func @ffm_kernel(%arg0: i32, %arg1: i32, %arg2: i32, %arg3: memref<1x2x128xf32, #tpu.memory_space<vmem>>, %arg4: memref<1x2x128xf32, #tpu.memory_space<vmem>>, %arg5: memref<8x2xbf16, #tpu.memory_space<vmem>>, %arg6: memref<8x2xbf16, #tpu.memory_space<vmem>>, %arg7: memref<8x1xf32, #tpu.memory_space<vmem>>, %arg8: memref<2x8xf32, #tpu.memory_space<vmem>>, %arg9: memref<8x2xf32, #tpu.memory_space<vmem>>, %arg10: memref<1x8x128xf32, #tpu.memory_space<vmem>>, %arg11: memref<8x1xf32, #tpu.memory_space<vmem>>, %arg12: memref<8x1xf32, #tpu.memory_space<vmem>>) attributes {dimension_semantics = [#tpu.dimension_semantics<parallel>, #tpu.dimension_semantics<arbitrary>, #tpu.dimension_semantics<arbitrary>], iteration_bounds = array<i64: 2, 2, 2>, scalar_prefetch = 0 : i64, scratch_operands = 2 : i64, tpu.core_type = #tpu.core_type<tc>, window_params = [{transform_indices = @transform_0, window_bounds = array<i64: 1, 2, 128>}, {transform_indices = @transform_1, window_bounds = array<i64: 1, 2, 128>}, {pipeline_mode = #tpu.pipeline_mode<synchronous>, transform_indices = @transform_2, window_bounds = array<i64: 8, 2>}, {pipeline_mode = #tpu.pipeline_mode<synchronous>, transform_indices = @transform_3, window_bounds = array<i64: 8, 2>}, {pipeline_mode = #tpu.pipeline_mode<synchronous>, transform_indices = @transform_4, window_bounds = array<i64: 8, 1>}, {pipeline_mode = #tpu.pipeline_mode<synchronous>, transform_indices = @transform_5, window_bounds = array<i64: 2, 8>}, {pipeline_mode = #tpu.pipeline_mode<synchronous>, transform_indices = @transform_6, window_bounds = array<i64: 8, 2>}, {transform_indices = @transform_7, window_bounds = array<i64: 1, 8, 128>}]} {
    %c0 = arith.constant 0 : index
    %c0_0 = arith.constant 0 : index
    %c0_1 = arith.constant 0 : index
    %0 = vector.load %arg3[%c0, %c0_0, %c0_1] : memref<1x2x128xf32, #tpu.memory_space<vmem>>, vector<1x2x128xf32>
    %1 = vector.shape_cast %0 : vector<1x2x128xf32> to vector<2x128xf32>
    %2 = arith.truncf %1 : vector<2x128xf32> to vector<2x128xbf16>
    %c0_2 = arith.constant 0 : index
    %c0_3 = arith.constant 0 : index
    %c0_4 = arith.constant 0 : index
    %3 = vector.load %arg4[%c0_2, %c0_3, %c0_4] : memref<1x2x128xf32, #tpu.memory_space<vmem>>, vector<1x2x128xf32>
    %4 = vector.shape_cast %3 : vector<1x2x128xf32> to vector<2x128xf32>
    %5 = arith.truncf %4 : vector<2x128xf32> to vector<2x128xbf16>
    %c0_5 = arith.constant 0 : index
    %c0_6 = arith.constant 0 : index
    %6 = vector.load %arg5[%c0_5, %c0_6] : memref<8x2xbf16, #tpu.memory_space<vmem>>, vector<8x2xbf16>
    %cst = arith.constant dense<0.000000e+00> : vector<8x128xf32>
    %7 = tpu.matmul %6, %2, %cst {dimension_numbers = #tpu.dot_dimension_numbers<[1], [0], [0], [1], [0, 0, 1, 1], [], []>} : vector<8x2xbf16>, vector<2x128xbf16>, vector<8x128xf32> -> vector<8x128xf32>
    %c0_7 = arith.constant 0 : index
    %c0_8 = arith.constant 0 : index
    %8 = vector.load %arg6[%c0_7, %c0_8] : memref<8x2xbf16, #tpu.memory_space<vmem>>, vector<8x2xbf16>
    %cst_9 = arith.constant dense<0.000000e+00> : vector<8x128xf32>
    %9 = tpu.matmul %8, %5, %cst_9 {dimension_numbers = #tpu.dot_dimension_numbers<[1], [0], [0], [1], [0, 0, 1, 1], [], []>} : vector<8x2xbf16>, vector<2x128xbf16>, vector<8x128xf32> -> vector<8x128xf32>
    %10 = arith.addf %7, %9 : vector<8x128xf32>
    %c0_10 = arith.constant 0 : index
    %c0_11 = arith.constant 0 : index
    %11 = vector.load %arg7[%c0_10, %c0_11] : memref<8x1xf32, #tpu.memory_space<vmem>>, vector<8x1xf32>
    %12 = vector.broadcast %11 : vector<8x1xf32> to vector<8x128xf32>
    %13 = arith.addf %10, %12 : vector<8x128xf32>
    %cst_12 = arith.constant 0.000000e+00 : f32
    %14 = vector.broadcast %cst_12 : f32 to vector<8x128xf32>
    %15 = arith.maximumf %13, %14 : vector<8x128xf32>
    %c0_i32 = arith.constant 0 : i32
    %16 = arith.cmpi eq, %arg1, %c0_i32 : i32
    %17 = arith.extui %16 : i1 to i32
    %c0_i32_13 = arith.constant 0 : i32
    %18 = arith.cmpi ne, %17, %c0_i32_13 : i32
    scf.if %18 {
      %c0_i32_15 = arith.constant 0 : i32
      %22 = arith.cmpi eq, %arg2, %c0_i32_15 : i32
      %23 = arith.extui %22 : i1 to i32
      %c0_i32_16 = arith.constant 0 : i32
      %24 = arith.cmpi ne, %23, %c0_i32_16 : i32
      scf.if %24 {
        %cst_24 = arith.constant 0.000000e+00 : f32
        %33 = vector.broadcast %cst_24 : f32 to vector<8x1xf32>
        %c0_25 = arith.constant 0 : index
        %c0_26 = arith.constant 0 : index
        %34 = vector.load %arg11[%c0_25, %c0_26] : memref<8x1xf32, #tpu.memory_space<vmem>>, vector<8x1xf32>
        tpu.vector_store %arg11[%c0_25, %c0_26], %33 {strides = array<i32>} : memref<8x1xf32, #tpu.memory_space<vmem>>, vector<8x1xf32>,
      } else {
      }
      %c0_17 = arith.constant 0 : index
      %c0_18 = arith.constant 0 : index
      %25 = vector.load %arg11[%c0_17, %c0_18] : memref<8x1xf32, #tpu.memory_space<vmem>>, vector<8x1xf32>
      %cst_19 = arith.constant dense<0.000000e+00> : vector<8xf32>
      %26 = vector.multi_reduction <add>, %15, %cst_19 [1] : vector<8x128xf32> to vector<8xf32>
      %27 = vector.shape_cast %26 : vector<8xf32> to vector<8x1xf32>
      %28 = arith.addf %25, %27 : vector<8x1xf32>
      %c0_20 = arith.constant 0 : index
      %c0_21 = arith.constant 0 : index
      %29 = vector.load %arg11[%c0_20, %c0_21] : memref<8x1xf32, #tpu.memory_space<vmem>>, vector<8x1xf32>
      tpu.vector_store %arg11[%c0_20, %c0_21], %28 {strides = array<i32>} : memref<8x1xf32, #tpu.memory_space<vmem>>, vector<8x1xf32>,
      %c1_i32_22 = arith.constant 1 : i32
      %30 = arith.cmpi eq, %arg2, %c1_i32_22 : i32
      %31 = arith.extui %30 : i1 to i32
      %c0_i32_23 = arith.constant 0 : i32
      %32 = arith.cmpi ne, %31, %c0_i32_23 : i32
      scf.if %32 {
        %c0_24 = arith.constant 0 : index
        %c0_25 = arith.constant 0 : index
        %33 = vector.load %arg11[%c0_24, %c0_25] : memref<8x1xf32, #tpu.memory_space<vmem>>, vector<8x1xf32>
        %cst_26 = arith.constant 3.906250e-03 : f32
        %34 = vector.broadcast %cst_26 : f32 to vector<8x1xf32>
        %35 = arith.mulf %33, %34 : vector<8x1xf32>
        %c0_27 = arith.constant 0 : index
        %c0_28 = arith.constant 0 : index
        %36 = vector.load %arg8[%c0_27, %c0_28] : memref<2x8xf32, #tpu.memory_space<vmem>>, vector<2x8xf32>
        %cst_29 = arith.constant dense<0.000000e+00> : vector<2x1xf32>
        %37 = tpu.matmul %36, %35, %cst_29 {dimension_numbers = #tpu.dot_dimension_numbers<[1], [0], [0], [1], [0, 0, 1, 1], [], []>} : vector<2x8xf32>, vector<8x1xf32>, vector<2x1xf32> -> vector<2x1xf32>
        %cst_30 = arith.constant 0.000000e+00 : f32
        %38 = vector.broadcast %cst_30 : f32 to vector<2x1xf32>
        %39 = arith.maximumf %37, %38 : vector<2x1xf32>
        %c0_31 = arith.constant 0 : index
        %c0_32 = arith.constant 0 : index
        %40 = vector.load %arg9[%c0_31, %c0_32] : memref<8x2xf32, #tpu.memory_space<vmem>>, vector<8x2xf32>
        %cst_33 = arith.constant dense<0.000000e+00> : vector<8x1xf32>
        %41 = tpu.matmul %40, %39, %cst_33 {dimension_numbers = #tpu.dot_dimension_numbers<[1], [0], [0], [1], [0, 0, 1, 1], [], []>} : vector<8x2xf32>, vector<2x1xf32>, vector<8x1xf32> -> vector<8x1xf32>
        %cst_34 = arith.constant 0.000000e+00 : f32
        %42 = vector.broadcast %cst_34 : f32 to vector<8x1xf32>
        %43 = arith.subf %42, %41 : vector<8x1xf32>
        %44 = math.exp %43 : vector<8x1xf32>
        %cst_35 = arith.constant 1.000000e+00 : f32
        %45 = vector.broadcast %cst_35 : f32 to vector<8x1xf32>
        %46 = arith.addf %45, %44 : vector<8x1xf32>
        %cst_36 = arith.constant 1.000000e+00 : f32
        %47 = vector.broadcast %cst_36 : f32 to vector<8x1xf32>
        %48 = arith.divf %47, %46 : vector<8x1xf32>
        %cst_37 = arith.constant 1.000000e+00 : f32
        %49 = vector.broadcast %cst_37 : f32 to vector<8x1xf32>
        %50 = arith.addf %48, %49 : vector<8x1xf32>
        %c0_38 = arith.constant 0 : index
        %c0_39 = arith.constant 0 : index
        %51 = vector.load %arg12[%c0_38, %c0_39] : memref<8x1xf32, #tpu.memory_space<vmem>>, vector<8x1xf32>
        tpu.vector_store %arg12[%c0_38, %c0_39], %50 {strides = array<i32>} : memref<8x1xf32, #tpu.memory_space<vmem>>, vector<8x1xf32>,
      } else {
      }
    } else {
    }
    %c1_i32 = arith.constant 1 : i32
    %19 = arith.cmpi eq, %arg1, %c1_i32 : i32
    %20 = arith.extui %19 : i1 to i32
    %c0_i32_14 = arith.constant 0 : i32
    %21 = arith.cmpi ne, %20, %c0_i32_14 : i32
    scf.if %21 {
      %c0_15 = arith.constant 0 : index
      %c0_16 = arith.constant 0 : index
      %22 = vector.load %arg12[%c0_15, %c0_16] : memref<8x1xf32, #tpu.memory_space<vmem>>, vector<8x1xf32>
      %23 = vector.broadcast %22 : vector<8x1xf32> to vector<8x128xf32>
      %24 = arith.mulf %15, %23 : vector<8x128xf32>
      %c0_17 = arith.constant 0 : index
      %c0_18 = arith.constant 0 : index
      %c0_19 = arith.constant 0 : index
      %25 = vector.load %arg10[%c0_17, %c0_18, %c0_19] : memref<1x8x128xf32, #tpu.memory_space<vmem>>, vector<1x8x128xf32>
      %26 = vector.shape_cast %25 : vector<1x8x128xf32> to vector<8x128xf32>
      %27 = vector.shape_cast %24 : vector<8x128xf32> to vector<1x8x128xf32>
      tpu.vector_store %arg10[%c0_17, %c0_18, %c0_19], %27 {strides = array<i32>} : memref<1x8x128xf32, #tpu.memory_space<vmem>>, vector<1x8x128xf32>,
    } else {
    }
    return
  }
  func.func @transform_0(%arg0: i32, %arg1: i32, %arg2: i32) -> (i32, i32, i32) {
    %c0_i32 = arith.constant 0 : i32
    %c0_i32_0 = arith.constant 0 : i32
    return %arg0, %c0_i32, %arg2 : i32, i32, i32
  }
  func.func @transform_1(%arg0: i32, %arg1: i32, %arg2: i32) -> (i32, i32, i32) {
    %c0_i32 = arith.constant 0 : i32
    %c0_i32_0 = arith.constant 0 : i32
    return %arg0, %c0_i32, %arg2 : i32, i32, i32
  }
  func.func @transform_2(%arg0: i32, %arg1: i32, %arg2: i32) -> (i32, i32) {
    %c0_i32 = arith.constant 0 : i32
    %c0_i32_0 = arith.constant 0 : i32
    %c0_i32_1 = arith.constant 0 : i32
    return %c0_i32, %c0_i32_0 : i32, i32
  }
  func.func @transform_3(%arg0: i32, %arg1: i32, %arg2: i32) -> (i32, i32) {
    %c0_i32 = arith.constant 0 : i32
    %c0_i32_0 = arith.constant 0 : i32
    %c0_i32_1 = arith.constant 0 : i32
    return %c0_i32, %c0_i32_0 : i32, i32
  }
  func.func @transform_4(%arg0: i32, %arg1: i32, %arg2: i32) -> (i32, i32) {
    %c0_i32 = arith.constant 0 : i32
    %c0_i32_0 = arith.constant 0 : i32
    %c0_i32_1 = arith.constant 0 : i32
    return %c0_i32, %c0_i32_0 : i32, i32
  }
  func.func @transform_5(%arg0: i32, %arg1: i32, %arg2: i32) -> (i32, i32) {
    %c0_i32 = arith.constant 0 : i32
    %c0_i32_0 = arith.constant 0 : i32
    %c0_i32_1 = arith.constant 0 : i32
    return %c0_i32, %c0_i32_0 : i32, i32
  }
  func.func @transform_6(%arg0: i32, %arg1: i32, %arg2: i32) -> (i32, i32) {
    %c0_i32 = arith.constant 0 : i32
    %c0_i32_0 = arith.constant 0 : i32
    %c0_i32_1 = arith.constant 0 : i32
    return %c0_i32, %c0_i32_0 : i32, i32
  }
  func.func @transform_7(%arg0: i32, %arg1: i32, %arg2: i32) -> (i32, i32, i32) {
    %0 = arith.muli %arg1, %arg2 : i32
    %c0_i32 = arith.constant 0 : i32
    %c0_i32_0 = arith.constant 0 : i32
    return %arg0, %c0_i32, %0 : i32, i32, i32
  }
}

</mosaic_0001>

<bundles_post_ra>
// kernel: tpu_custom_call.1
= control target key start
LH: loop header
LB: loop body
LE: loop exit
PB: predicated region body
PF: predicated region fallthrough
CT: control target
= control target key end

     0   :  { %s1093_s0 = inlined_call_operand.vmem [shape: f32[2,2,256], index: 0, kind: input, shape index: {}]   ;;  %s1094_s1 = inlined_call_operand.vmem [shape: f32[2,2,256], index: 1, kind: input, shape index: {}]   ;;  %s1095_s2 = inlined_call_operand.vmem [shape: bf16[8,2], index: 2, kind: input, shape index: {}]   ;;  %s1096_s3 = inlined_call_operand.vmem [shape: bf16[8,2], index: 3, kind: input, shape index: {}]   ;;  %s1097_s4 = inlined_call_operand.vmem [shape: f32[8,1], index: 4, kind: input, shape index: {}]   ;;  %s1098_s5 = inlined_call_operand.vmem [shape: f32[2,8], index: 5, kind: input, shape index: {}]   ;;  %s1099_s6 = inlined_call_operand.vmem [shape: f32[8,2], index: 6, kind: input, shape index: {}]   ;;  %s1100_s7 = inlined_call_operand.hbm [shape: f32[2,8,256], index: 7, kind: output, shape index: {}]  }
   0x1   :  { %1108 = sst [smem:[#allocation14_spill]] %s1093_s0 }
   0x2   :  { %12 = vsyncpa [#allocation5], 0 }
   0x3   :  { %14 = vsyncpa [#allocation5 + $0x1], 0  ;;  %s903_s24 = smov 0   ;;  %s905_s25 = smov 0  }
   0x4   :  { %s907_s26 = smov 0   ;;  %s909_s27 = smov 0  }
   0x5   :  { %s911_s28 = smov 0   ;;  %s913_s29 = smov 0  }
   0x6   :  { %s915_s30 = smov 0   ;;  %s917_s8 = smov 0  }
   0x7   :  { %s919_s9 = smov 0   ;;  %s921_s10 = smov 0  }
   0x8 LB: > { %1109 = sst [smem:[#allocation7_spill]] %s846_s30  ;;  %s628_s11 = sadd.s32 4294967295, %s858_s10   ;;  %s858_s10 = sphi %s921_s10, %s20_s10   ;;  %s854_s9 = sphi %s919_s9, %s1126_s9   ;;  %s850_s8 = sphi %s917_s8, %s1125_s8   ;;  %s846_s30 = sphi %s915_s30, %s1124_s30   ;;  %s842_s29 = sphi %s913_s29, %s1123_s29   ;;  %s838_s28 = sphi %s911_s28, %s1122_s28   ;;  %s834_s27 = sphi %s909_s27, %s1121_s27   ;;  %s830_s26 = sphi %s907_s26, %s1129_s26   ;;  %s826_s25 = sphi %s905_s25, %s1128_s25   ;;  %s822_s24 = sphi %s903_s24, %s1127_s24  }
   0x9   : > { %1110 = sst [smem:[#allocation8_spill]] %s850_s8  ;;  %s629_s12 = sadd.s32 4294967294, %s858_s10  }
   0xa   : > { %1111 = sst [smem:[#allocation9_spill]] %s854_s9  ;;  %s32_s13 = sadd.s32 1, %s846_s30 }
   0xb   : > { %p33_p0 = scmp.ge.s32.totalorder %s32_s13, 2  ;;  %s35_s14 = sadd.s32 1, %s850_s8 }
   0xc   : > { %s39_s15 = sadd.s32 1, %s854_s9  ;;  %s204_s16 = smul.u32 %s846_s30, %s850_s8 }
   0xd   : > { %s1131_s13 = smov (%p33_p0, %s32_s13), 0  ;;  %s1133_s14 = smov (!%p33_p0, %s35_s14), %s850_s8 }
   0xe   : > { %1112 = sst [smem:[#allocation10_spill]] %s1131_s13  ;;  %p221_p1 = scmp.ne.s32.totalorder %s830_s26, %s826_s25 }
   0xf   : > { %p222_p2 = scmp.eq.s32.totalorder %s628_s11, 7  ;;  %p37_p3 = scmp.ge.s32.totalorder %s1133_s14, 2 }
  0x10   : > { %p227_p4 = scmp.ne.s32.totalorder %s826_s25, %s822_s24  ;;  %p228_p6 = scmp.eq.s32.totalorder %s629_s12, 7 }
  0x11   : > { %p967_p5 = por %p222_p2, %p221_p1  ;;  %s1135_s14 = smov (%p37_p3, %s1133_s14), 0 }
  0x12   : > { %1114 = sst [smem:[#allocation11_spill]] %s1135_s14  ;;  %s1137_s15 = smov (!%p37_p3, %s39_s15), %s854_s9 }
  0x13   : > { %s205_s18 = smul.u32 %s1135_s14, %s1131_s13  ;;  %p976_p7 = por %p228_p6, %p227_p4 }
  0x14   : > { %p41_p8 = scmp.ge.s32.totalorder %s1137_s15, 2  ;;  %p632_p9 = scmp.ge.s32.totalorder %s858_s10, 1 }
  0x15   : > { %s207_s20 = ssub.s32 %s204_s16, %s205_s18  ;;  %p283_p10 = scmp.lt.s32.totalorder %s858_s10, 9 }
  0x16   : > { %s1139_s15 = smov (%p41_p8, %s1137_s15), 0  ;;  %s211_s23 = sadd.s32 1, %s830_s26 }
  0x17   : > { %1116 = sst [smem:[#allocation12_spill]] %s1139_s15  ;;  %p284_p11 = pnand %p632_p9, %p283_p10 }
  0x18   : > { %s206_s21 = ssub.s32 %s854_s9, %s1139_s15  ;;  %s1107_s12 = sand.u32 (!%p284_p11), 1, %s826_s25  }
  0x19   : > { %s208_s22 = sor.u32 %s207_s20, %s206_s21  ;;  %p326_p13 = scmp.lt.s32.totalorder (!%p284_p11), %s842_s29, 1 }
  0x1a   : > { %p209_p12 = scmp.eq.s32.totalorder %s208_s22, 0  ;;  %287 = sbr.rel (%p284_p11) target bundleno = 748 (0x2ec), region = 48 }
  0x1b   : > { %s994_s16 = sshll.u32 (!%p284_p11), %s1107_s12, 3  ;;  %p328_p0 = scmp.lt.s32.totalorder (!%p284_p11), %s834_s27, 1 }
  0x1c   : > { %s988_s11 = scalar_select %p209_p12, %s830_s26, %s211_s23  }
  0x1d   : > { %s1118_s0 = sld [smem:[#allocation14_spill]] (!%p284_p11)  ;;  %s325_s30 = scalar_lea.vmem (!%p284_p11), [#allocation4], %s994_s16 }
  0x1e   : > { %1117 = sst [smem:[#allocation13_spill]] %s988_s11  ;;  %p640_p1 = scmp.ne.s32.totalorder (!%p284_p11), %s838_s28, 0 }
  0x1f   : > { %v390_v0 = vld [vmem:[%s1097_s4] sm:$0xff]  ;;  %v860_v1 = vmov 0   ;;  %s327_s20 = scalar_select %p326_p13, %s842_s29, 1  ;;  %vm354_vm0 = vcmask 1040384   ;;  %vm350_vm1 = vcmask 15360  }
  0x20   : > { %742 = vset.pattern.permute.xlu0 %v860_v1  ;;  %s329_s21 = scalar_select %p328_p0, %s834_s27, 1  ;;  %v349_v8 = vld [vmem:[%s1096_s3] sm:$0xf] }
  0x21   : > { %393 = vperm.xlu0 %742, %v390_v0   ;;  %s634_s22 = sshll.u32 %s327_s20, 1  ;;  %v348_v9 = vld [vmem:[%s1095_s2] sm:$0xf]  ;;  %p641_p2 = scmp.ne.s32.totalorder (!%p640_p1), %s834_s27, 0 }
  0x22   : > { %s331_s23 = sadd.s32 %s634_s22, %s329_s21 }
  0x23   : > { %s635_s14 = sshll.u32 %s331_s23, 1 }
  0x24   : > { %s341_s8 = scalar_lea.vmem %s1094_s1, %s635_s14  ;;  %s333_s11 = scalar_lea.vmem %s1118_s0, %s635_s14 }
  0x25   : > { %v346_v2 = vld [vmem:[%s341_s8] sm:$0x3] }
  0x26   : > { %v344_v3 = vld [vmem:[%s333_s11] sm:$0x3]  ;;  %v347_v4 = vpack.c.bf16 %v346_v2, %v346_v2 }
  0x27   : > { %v345_v5 = vpack.c.bf16 %v344_v3, %v344_v3 }
  0x28   : > { %v356_v6 = vsel %vm354_vm0, %v347_v4, 0 }
  0x29   : > { %v375_v7 = vsel %vm354_vm0, %v345_v5, 0  ;;  %365 = vmatpush.bf16.msra.mxu0 %v356_v6 }
  0x2a   : > { %384 = vmatpush.bf16.msra.mxu1 %v375_v7 }
  0x2c   : > { %638 = vmatmul.msk.bf16.vlgmr.msra.gmra.mxu0 %vm350_vm1, %v349_v8 }
  0x2d   : > { %639 = vmatmul.msk.bf16.vlgmr.msra.gmra.mxu1 %vm350_vm1, %v348_v9 }
  0x93   : > { %v394_v10 = vpop.permute.xlu0 %393 }
  0xa9   : > { %v367_v11 = vpop.f32.mrf.mxu0 }
  0xaa   : > { %v386_v12 = vpop.f32.mrf.mxu1 }
  0xab   : > { %v387_v13 = vadd.f32 %v386_v12, %v367_v11 }
  0xad   : > { %v1016_v14 = vadd.f32 %v394_v10, %v387_v13 }
  0xae   : > { %401 = sbr.rel (%p640_p1) target bundleno = 603 (0x25b), region = 52 }
  0xaf   : > { %v397_v15 = vmax.f32 %v1016_v14, 0.0 }
  0xb1   : > { %v369_v16 = vpop.f32.mrf.mxu0 }
  0xb2   : > { %v388_v17 = vpop.f32.mrf.mxu1 }
  0xb3   : > { %405 = sbr.rel (%p641_p2) target bundleno = 186 (0xba), region = 56 }
  0xb8   : > { %vm406_vm2 = vcmask 7168   ;;  %v861_v18 = vmov 0.0  }
  0xb9   : > { %407 = vst.msk [vmem:[#allocation2] sm:$0xff] %vm406_vm2, %v861_v18 }
  0xba PF: > { %409 = vadd.xlane.f32.xlu0 %v397_v15  ;;  %vm412_vm3 = vcmask 7168   ;;  %p642_p3 = scmp.ne.s32.totalorder %s834_s27, 1 }
  0xc0   : > { %v408_v19 = vld [vmem:[#allocation2] sm:$0xff] }
 0x12c   : > { %417 = sbr.rel (%p642_p3) target bundleno = 603 (0x25b), region = 60 }
 0x12d   : > { %v410_v20 = vpop.xlane.xlu0 %409 }
 0x12e   : > { %v411_v21 = vadd.f32 %v410_v20, %v408_v19 }
 0x130   : > { %413 = vst.msk [vmem:[#allocation2] sm:$0xff] %vm412_vm3, %v411_v21 }
 0x131   : > { %v420_v24 = vld [vmem:[%s1098_s5] sm:$0x3]  ;;  %vm421_vm4 = vcmask 64512   ;;  %vm450_vm5 = vcmask 1041408  }
 0x132   : > { %v446_v27 = vld [vmem:[%s1099_s6] sm:$0xff] }
 0x137   : > { %v418_v22 = vld [vmem:[#allocation2] sm:$0xff] }
 0x138   : > { %v419_v23 = vmul.f32 0.00390625, %v418_v22 }
 0x13a   : > { %440 = vmatpush.msra.mxu0 %v419_v23 }
 0x13b   : > { %643 = vmatmul.msk.f32.vlgmr.msra.gmra.mxu0 %vm421_vm4, %v420_v24 }
 0x1b8   : > { %v442_v25 = vpop.f32.mrf.mxu0 }
 0x1b9   : > { %v445_v26 = vmax.f32 %v442_v25, 0.0 }
 0x1bb   : > { %644 = vmatpush.msk.msra.mxu1 %vm450_vm5, %v445_v26 }
 0x1bc   : > { %645 = vmatmul.msk.f32.vlgmr.msra.gmra.mxu1 %vm350_vm1, %v446_v27 }
 0x239   : > { %v471_v28 = vpop.f32.mrf.mxu1 }
 0x23a   : > { %v474_v29 = vsub.f32 0.0, %v471_v28 }
 0x23c   : > { %v475_v30 = vmul.f32 1.442695, %v474_v29 }
 0x23e   : > { %743 = vpow2.f32 %v475_v30 }
 0x244   : > { %v744_v31 = vpop.eup %743 }
 0x245   : > { %v477_v32 = vadd.f32 1.0, %v744_v31 }
 0x247   : > { %745 = vrcp.f32 %v477_v32  ;;  %v489_v36 = vand.u32 2147483648, %v477_v32  ;;  %v487_v38 = vand.u32 2147483647, %v477_v32  ;;  %vm483_vm7 = vweird.f32 %v477_v32 }
 0x249   : > { %v490_v40 = vor.u32 1.1754944e-38, %v489_v36  ;;  %vm488_vm9 = vcmp.eq.f32.partialorder %v487_v38, 8.507059e+37 }
 0x24d   : > { %v746_v33 = vpop.eup %745 }
 0x24e   : > { %v479_v34 = vmul.f32 %v746_v33, %v477_v32  ;;  %vm484_vm6 = vweird.f32 %v746_v33 }
 0x24f   : > { %vm485_vm8 = vmor %vm483_vm7, %vm484_vm6 }
 0x250   : > { %v480_v35 = vsub.f32 1.0, %v479_v34 }
 0x252   : > { %v481_v37 = vmul.f32 %v746_v33, %v480_v35 }
 0x254   : > { %v482_v39 = vadd.f32 %v746_v33, %v481_v37 }
 0x256   : > { %v486_v41 = vsel %vm485_vm8, %v746_v33, %v482_v39 }
 0x257   : > { %v491_v42 = vsel %vm488_vm9, %v490_v40, %v486_v41 }
 0x258   : > { %v493_v43 = vadd.f32 1.0, %v491_v42 }
 0x25a   : > { %494 = vst.msk [vmem:[#allocation3] sm:$0xff] %vm412_vm3, %v493_v43 }
 0x25b PF: > { %p646_p4 = scmp.ne.s32.totalorder %s838_s28, 1 }
 0x25d   : > { %498 = sbr.rel (%p646_p4) target bundleno = 730 (0x2da), region = 64 }
 0x262   : > { %v499_v44 = vld [vmem:[#allocation3] sm:$0xff]  ;;  %v862_v45 = vmov 0  }
 0x263   : > { %747 = vset.pattern.permute.xlu0 %v862_v45 }
 0x264   : > { %502 = vperm.xlu0 %747, %v499_v44  }
 0x2d6   : > { %v503_v46 = vpop.permute.xlu0 %502 }
 0x2d7   : > { %v505_v47 = vmul.f32 %v503_v46, %v397_v15 }
 0x2d9   : > { %506 = vst [vmem:[%s325_s30] sm:$0xff] %v505_v47 }
 0x2da PF: > { %s515_s20 = smul.u32 %s834_s27, %s838_s28  ;;  %s648_s21 = sshll.u32 %s842_s29, 1 }
 0x2db   : > { %s523_s22 = sshll.u32 %s325_s30, 4  ;;  %s1119_s14 = sand.u32 1, %s826_s25   ;;  %s524_s22 = int_to_ptr.vmem [resolvable:$true] %s523_s22 }
 0x2dc   : > { %s519_s23 = sadd.s32 %s648_s21, %s515_s20  ;;  %s508_s11 = scalar_lea.sflag [#allocation5], %s1119_s14 }
 0x2dd   : > { %s649_s15 = sshll.u32 %s519_s23, 3  ;;  %s768_s29 = scalar_lea.hbm %s1100_s7, 32 }
 0x2de   : > { %s521_s13 = scalar_lea.hbm %s1100_s7, %s649_s15 }
 0x2df   : > { %s525_s8 = sshll.u32 %s521_s13, 4  ;;  %s526_s8 = int_to_ptr.hbm [resolvable:$true] %s525_s8 }
 0x2e0   : > { %s762_s12 = sshra.s32 %s526_s8, 4  ;;  %s763_s12 = int_to_ptr.hbm [resolvable:$true] %s762_s12 }
 0x2e1   : > { %s764_s0 = scalar_lea.hbm %s763_s12, 8  ;;  %p769_p10 = scmp.lt.s32.totalorder %s763_s12, %s1100_s7 }
 0x2e2   : > { %p765_p6 = scmp.ne.s32.totalorder %s763_s12, %s764_s0  ;;  %p770_p11 = scmp.lt.s32.totalorder %s768_s29, %s764_s0 }
 0x2e4   : > { %p766_p8 = pnand %p765_p6, %p967_p5  ;;  %p771_p12 = por %p770_p11, %p769_p10 }
 0x2e6   : > { %p767_p9 = pneg %p766_p8 }
 0x2e8   : > { %p772_p13 = pnand %p771_p12, %p767_p9 }
 0x2ea   : > { %775 = shalt.err (!%p772_p13)
}
 0x2eb   : > { %652 = dma.vmem_to_hbm [thread:$0]  (%p967_p5), %s524_s22, 128, %s526_s8, %s508_s11  }
 0x2ec PF: > { %p658_p0 = scmp.ge.s32.totalorder %s858_s10, 2  ;;  %s537_s20 = sand.u32 1, %s822_s24  }
 0x2ed   : > { %s538_s21 = scalar_lea.sflag [#allocation5], %s537_s20 }
 0x2ee   : > { %p655_p1 = pnand %p658_p0, %p976_p7 }
 0x2f0   : > { %p656_p2 = pneg %p655_p1 }
 0x2f2   : > { %817 = dma.done.wait (%p656_p2), %s538_s21, 128  }
 0x2f3   : > { %819 = vsyncadd (%p656_p2), %s538_s21, 4294967168  ;;  %s20_s10 = sadd.s32 1, %s858_s10   ;;  %s1120_s0 = sld [smem:[#allocation13_spill]] }
 0x2f4   : > { %p17_p3 = scmp.ge.s32.totalorder %s20_s10, 10   ;;  %s1121_s27 = sld [smem:[#allocation7_spill]] }
 0x2f5   : > { %s1122_s28 = sld [smem:[#allocation8_spill]]  ;;  %s1127_s24 = smov %s826_s25 }
 0x2f6   : > { %s1123_s29 = sld [smem:[#allocation9_spill]]  ;;  %s1128_s25 = smov %s830_s26 }
 0x2f7   : > { %s1124_s30 = sld [smem:[#allocation10_spill]]  ;;  %19 = sbr.rel (!%p17_p3) target bundleno = 8 (0x8), region = 102 }
 0x2f8   : > { %s1125_s8 = sld [smem:[#allocation11_spill]] }
 0x2f9   : > { %s1126_s9 = sld [smem:[#allocation12_spill]]  ;;  %s1129_s26 = smov %s1120_s0 }
 0x2fc   :  { %544 = vsyncpa [#allocation5], 1 }
 0x2fd   :  { %546 = vsyncpa [#allocation5 + $0x1], 1 }

</bundles_post_ra>
